<compile_context>
chip_gen: v7x
topology: tpu7x:2x2x1
jax: 0.10.0
libtpu: 0.0.40
codegen_flags: <defaults>
</compile_context>

<pallas_src>
import math

import jax
import jax.numpy as jnp
from jax.experimental import pallas as pl
from jax.experimental.pallas import tpu as pltpu


def _make_attention_kernel(tb, p, e):
    """Kernel processing `tb` batch elements (tb*p rows of embed width e) per grid step."""
    n = tb * p
    inv_norm = 1.0 / float(p * e)
    eps = 1e-5

    def kernel(x_ref, g_ref, b_ref, wqkv_ref, bqkv_ref, mask_ref, bias_ref, out_ref):
        x = x_ref[...]                        # (n, e) f32 rows (lane-dense, e = 128)
        mask_f = mask_ref[...]                # (n, n) f32 block-diagonal 0/1 "same batch"

        # ---- LayerNorm over each batch element's full in_size (= p rows x e lanes) ----
        # Lane reduction first (XLU), then a tiny (n,n)@(n,1) mask matmul -> 4*n^2 FLOPs
        # instead of the old 4*n^2*e full-width mask matmuls. Stats stay f32.
        rowsum = jnp.sum(x, axis=-1, keepdims=True)                           # (n, 1)
        mu = jnp.dot(mask_f, rowsum, preferred_element_type=jnp.float32) * inv_norm
        xc = x - mu
        sqsum = jnp.sum(xc * xc, axis=-1, keepdims=True)                      # (n, 1)
        var = jnp.dot(mask_f, sqsum, preferred_element_type=jnp.float32) * inv_norm
        xn = xc * jax.lax.rsqrt(var + eps) * g_ref[...] + b_ref[...]          # (n, e) f32

        # ---- fused Q/K/V projection: one (n,e)@(e,3e) MXU matmul, bf16 in / f32 acc ----
        qkv = jnp.dot(xn.astype(jnp.bfloat16), wqkv_ref[...],
                      preferred_element_type=jnp.float32) + bqkv_ref[...]     # (n, 3e)
        q = qkv[:, 0 * e:1 * e]   # 1/sqrt(e) already folded into W_Q / b_Q in the wrapper
        k = qkv[:, 1 * e:2 * e]
        v = qkv[:, 2 * e:3 * e]

        # ---- scores: block-diagonal bmm(Q, K^T) as one 2-D matmul + additive mask ----
        s = jax.lax.dot_general(q.astype(jnp.bfloat16), k.astype(jnp.bfloat16),
                                (((1,), (1,)), ((), ())),
                                preferred_element_type=jnp.float32)           # (n, n)
        s = s + bias_ref[...]                  # -1e30 on cross-batch entries

        # torch Softmax(dim=1) == normalize over the QUERY (row) axis per key column.
        m = jnp.max(s, axis=0, keepdims=True)
        ex = jnp.exp(s - m)                                                    # f32
        denom = jnp.sum(ex, axis=0, keepdims=True)
        attn = ex * pl.reciprocal(denom, approx=True)   # EUP reciprocal + VPU multiply

        # ---- bmm(attn, V) collapses to one 2-D matmul (bf16 in / f32 acc) + residual ----
        prod = jnp.dot(attn.astype(jnp.bfloat16), v.astype(jnp.bfloat16),
                       preferred_element_type=jnp.float32)                    # (n, e)
        out_ref[...] = prod + x

    return kernel


def _auto_batch_tile(b_sz, p, target_rows=256):
    """Largest divisor tb of b_sz with tb*p 8-aligned and <= target_rows, preferring
    >= 2 grid steps so the 'parallel' batch-tile axis can shard across v7x's 2 TCs."""
    divs = [t for t in range(1, b_sz + 1) if b_sz % t == 0]
    ok = [t for t in divs if (t * p) % 8 == 0 and t * p <= target_rows]
    multi = [t for t in ok if b_sz // t >= 2]
    if multi:
        return max(multi)
    if ok:
        return max(ok)
    return b_sz  # single full-batch block fallback (block shape == full array is legal)


def attention_forward(x, params, n_partitions, *, batch_tile=None):
    """Fused Pallas forward of the PyTorch Attention module. x: (B, in_size)."""
    gamma, beta, wq, bq, wk, bk, wv, bv = params
    b_sz, d = x.shape
    p = n_partitions
    e = d // p
    assert p * e == d, "in_size must be divisible by n_partitions"

    tb = _auto_batch_tile(b_sz, p) if batch_tile is None else batch_tile
    assert b_sz % tb == 0, "batch must divide evenly into batch tiles"
    n = tb * p
    num_blocks = b_sz // tb
    assert (n % 8 == 0) or (num_blocks == 1), "rows per block must be 8-aligned"

    inv_scale = 1.0 / math.sqrt(float(e))
    # Fold 1/sqrt(e) into the Q columns; pack Q/K/V into one bf16 MXU operand.
    wqkv = jnp.concatenate([wq * inv_scale, wk, wv], axis=1).astype(jnp.bfloat16)  # (e,3e)
    bqkv = jnp.concatenate([bq * inv_scale, bk, bv],
                           axis=0).reshape(1, 3 * e).astype(jnp.float32)           # (1,3e)

    # LayerNorm affine tiled per block row. Loop-invariant + constant index_map so it is
    # DMA'd once per call; kept pre-tiled in HBM (an in-kernel (tb,1) tile of a (p,e)
    # array with p < 8 sublanes is a risky relayout, and the footprint here is tiny).
    g_tiled = jnp.tile(gamma.reshape(p, e), (tb, 1))                 # (n, e)
    b_tiled = jnp.tile(beta.reshape(p, e), (tb, 1))                  # (n, e)

    # Precompute the block-diagonal mask + additive score bias ONCE (resident inputs)
    # instead of iota // p + compare every grid step.
    rb = jnp.arange(n, dtype=jnp.int32) // p
    same = rb[:, None] == rb[None, :]
    mask_f = same.astype(jnp.float32)                                # (n, n)
    neg_bias = jnp.where(same, 0.0, -1e30).astype(jnp.float32)       # (n, n)

    x2 = x.reshape(b_sz * p, e).astype(jnp.float32)                  # lane-dense rows

    kernel = _make_attention_kernel(tb, p, e)

    flops_per_block = (
        2 * 2 * n * n              # two (n,n)@(n,1) LayerNorm stat matmuls
        + 2 * n * e * (3 * e)      # fused QKV projection
        + 2 * n * n * e            # scores
        + 2 * n * n * e            # attn @ V
    )
    cost = pl.CostEstimate(
        flops=int(num_blocks * flops_per_block),
        transcendentals=int(num_blocks * (n * n + 2 * n)),   # exp + rsqrt + reciprocal
        bytes_accessed=int(4 * 2 * b_sz * d                  # x in + out (f32)
                           + 2 * e * 3 * e + 4 * 3 * e       # bf16 wqkv + f32 bqkv
                           + 4 * 2 * n * e                   # gamma / beta tiles
                           + 4 * 2 * n * n),                 # mask + bias
    )

    out2 = pl.pallas_call(
        kernel,
        out_shape=jax.ShapeDtypeStruct((b_sz * p, e), jnp.float32),
        grid_spec=pltpu.PrefetchScalarGridSpec(
            num_scalar_prefetch=0,
            grid=(num_blocks,),
            in_specs=[
                pl.BlockSpec((n, e), lambda i: (i, 0)),          # x rows (batch tile)
                pl.BlockSpec((n, e), lambda i: (0, 0)),          # LayerNorm gamma (resident)
                pl.BlockSpec((n, e), lambda i: (0, 0)),          # LayerNorm beta  (resident)
                pl.BlockSpec((e, 3 * e), lambda i: (0, 0)),      # packed bf16 W_{Q,K,V}
                pl.BlockSpec((1, 3 * e), lambda i: (0, 0)),      # packed f32 b_{Q,K,V}
                pl.BlockSpec((n, n), lambda i: (0, 0)),          # block-diag 0/1 mask
                pl.BlockSpec((n, n), lambda i: (0, 0)),          # additive score bias
            ],
            out_specs=pl.BlockSpec((n, e), lambda i: (i, 0)),
        ),
        compiler_params=pltpu.CompilerParams(
            dimension_semantics=("parallel",)),                  # batch tiles -> megacore
        cost_estimate=cost,
    )(x2, g_tiled, b_tiled, wqkv, bqkv, mask_f, neg_bias)

    return out2.reshape(b_sz, d)


def attention_reference(x, params, n_partitions):
    """Pure-JAX f32 reference matching the PyTorch forward exactly."""
    gamma, beta, wq, bq, wk, bk, wv, bv = params
    b_sz, d = x.shape
    p = n_partitions
    e = d // p
    eps = 1e-5
    mu = jnp.mean(x, axis=-1, keepdims=True)
    var = jnp.mean((x - mu) ** 2, axis=-1, keepdims=True)
    xn = (x - mu) / jnp.sqrt(var + eps) * gamma + beta
    xr = xn.reshape(b_sz, p, e)
    q = xr @ wq + bq
    k = xr @ wk + bk
    v = xr @ wv + bv
    s = jnp.einsum("bpe,bqe->bpq", q, k) / jnp.sqrt(float(e))
    a = jax.nn.softmax(s, axis=1)          # torch nn.Softmax(dim=1)
    prod = jnp.einsum("bpq,bqe->bpe", a, v)
    return prod.reshape(b_sz, d) + x


def init_params(key, in_size, n_partitions):
    e = in_size // n_partitions
    ks = jax.random.split(key, 8)
    s = 1.0 / math.sqrt(float(e))
    gamma = 1.0 + 0.1 * jax.random.normal(ks[0], (in_size,), jnp.float32)
    beta = 0.1 * jax.random.normal(ks[1], (in_size,), jnp.float32)
    # Linear weights stored as (in, out) so y = x @ W + b (transpose of torch layout).
    wq = s * jax.random.normal(ks[2], (e, e), jnp.float32)
    bq = s * jax.random.normal(ks[3], (e,), jnp.float32)
    wk = s * jax.random.normal(ks[4], (e, e), jnp.float32)
    bk = s * jax.random.normal(ks[5], (e,), jnp.float32)
    wv = s * jax.random.normal(ks[6], (e, e), jnp.float32)
    bv = s * jax.random.normal(ks[7], (e,), jnp.float32)
    return gamma, beta, wq, bq, wk, bk, wv, bv


if __name__ == "__main__":
    # Attention(in_size=512, n_partitions=4) -> embed_dim = 128 (lane-dense), batch = 8.
    B, n_partitions, embed_dim = 8, 4, 128
    in_size = n_partitions * embed_dim

    key = jax.random.PRNGKey(0)
    kx, kp = jax.random.split(key)
    x = jax.random.normal(kx, (B, in_size), jnp.float32)
    params = init_params(kp, in_size, n_partitions)

    # Auto batch_tile -> tb=4 here (n=16 rows/block, 2 parallel grid steps for v7x).
    out = attention_forward(x, params, n_partitions)
    out = jax.block_until_ready(out)

    ref = attention_reference(x, params, n_partitions)
    assert out.shape == (B, in_size)
    err = jnp.max(jnp.abs(out - ref))
    # MXU operands are bf16 (f32 accumulation), so compare at a bf16-appropriate tolerance.
    assert jnp.allclose(out, ref, rtol=5e-2, atol=5e-2), f"max abs err {err}"

    print("KERNEL_OK")
</pallas_src>

<mosaic_0001>
module attributes {stable_mosaic.version = 11 : i64} {
  func.func @kernel(%arg0: i32, %arg1: memref<16x128xf32, #tpu.memory_space<vmem>>, %arg2: memref<16x128xf32, #tpu.memory_space<vmem>>, %arg3: memref<16x128xf32, #tpu.memory_space<vmem>>, %arg4: memref<128x384xbf16, #tpu.memory_space<vmem>>, %arg5: memref<1x384xf32, #tpu.memory_space<vmem>>, %arg6: memref<16x16xf32, #tpu.memory_space<vmem>>, %arg7: memref<16x16xf32, #tpu.memory_space<vmem>>, %arg8: memref<16x128xf32, #tpu.memory_space<vmem>>) attributes {dimension_semantics = [#tpu.dimension_semantics<parallel>], iteration_bounds = array<i64: 2>, scalar_prefetch = 0 : i64, scratch_operands = 0 : i64, tpu.core_type = #tpu.core_type<tc>, window_params = [{transform_indices = @transform_0, window_bounds = array<i64: 16, 128>}, {pipeline_mode = #tpu.pipeline_mode<synchronous>, transform_indices = @transform_1, window_bounds = array<i64: 16, 128>}, {pipeline_mode = #tpu.pipeline_mode<synchronous>, transform_indices = @transform_2, window_bounds = array<i64: 16, 128>}, {pipeline_mode = #tpu.pipeline_mode<synchronous>, transform_indices = @transform_3, window_bounds = array<i64: 128, 384>}, {pipeline_mode = #tpu.pipeline_mode<synchronous>, transform_indices = @transform_4, window_bounds = array<i64: 1, 384>}, {pipeline_mode = #tpu.pipeline_mode<synchronous>, transform_indices = @transform_5, window_bounds = array<i64: 16, 16>}, {pipeline_mode = #tpu.pipeline_mode<synchronous>, transform_indices = @transform_6, window_bounds = array<i64: 16, 16>}, {transform_indices = @transform_7, window_bounds = array<i64: 16, 128>}]} {
    %c0 = arith.constant 0 : index
    %c0_0 = arith.constant 0 : index
    %0 = vector.load %arg1[%c0, %c0_0] : memref<16x128xf32, #tpu.memory_space<vmem>>, vector<16x128xf32>
    %c0_1 = arith.constant 0 : index
    %c0_2 = arith.constant 0 : index
    %1 = vector.load %arg6[%c0_1, %c0_2] : memref<16x16xf32, #tpu.memory_space<vmem>>, vector<16x16xf32>
    %cst = arith.constant dense<0.000000e+00> : vector<16xf32>
    %2 = vector.multi_reduction <add>, %0, %cst [1] : vector<16x128xf32> to vector<16xf32>
    %3 = vector.shape_cast %2 : vector<16xf32> to vector<16x1xf32>
    %cst_3 = arith.constant dense<0.000000e+00> : vector<16x1xf32>
    %4 = tpu.matmul %1, %3, %cst_3 {dimension_numbers = #tpu.dot_dimension_numbers<[1], [0], [0], [1], [0, 0, 1, 1], [], []>} : vector<16x16xf32>, vector<16x1xf32>, vector<16x1xf32> -> vector<16x1xf32>
    %cst_4 = arith.constant 0.001953125 : f32
    %5 = vector.broadcast %cst_4 : f32 to vector<16x1xf32>
    %6 = arith.mulf %4, %5 : vector<16x1xf32>
    %7 = vector.broadcast %6 : vector<16x1xf32> to vector<16x128xf32>
    %8 = arith.subf %0, %7 : vector<16x128xf32>
    %9 = arith.mulf %8, %8 : vector<16x128xf32>
    %cst_5 = arith.constant dense<0.000000e+00> : vector<16xf32>
    %10 = vector.multi_reduction <add>, %9, %cst_5 [1] : vector<16x128xf32> to vector<16xf32>
    %11 = vector.shape_cast %10 : vector<16xf32> to vector<16x1xf32>
    %cst_6 = arith.constant dense<0.000000e+00> : vector<16x1xf32>
    %12 = tpu.matmul %1, %11, %cst_6 {dimension_numbers = #tpu.dot_dimension_numbers<[1], [0], [0], [1], [0, 0, 1, 1], [], []>} : vector<16x16xf32>, vector<16x1xf32>, vector<16x1xf32> -> vector<16x1xf32>
    %cst_7 = arith.constant 0.001953125 : f32
    %13 = vector.broadcast %cst_7 : f32 to vector<16x1xf32>
    %14 = arith.mulf %12, %13 : vector<16x1xf32>
    %cst_8 = arith.constant 9.99999974E-6 : f32
    %15 = vector.broadcast %cst_8 : f32 to vector<16x1xf32>
    %16 = arith.addf %14, %15 : vector<16x1xf32>
    %17 = math.rsqrt %16 : vector<16x1xf32>
    %18 = vector.broadcast %17 : vector<16x1xf32> to vector<16x128xf32>
    %19 = arith.mulf %8, %18 : vector<16x128xf32>
    %c0_9 = arith.constant 0 : index
    %c0_10 = arith.constant 0 : index
    %20 = vector.load %arg2[%c0_9, %c0_10] : memref<16x128xf32, #tpu.memory_space<vmem>>, vector<16x128xf32>
    %21 = arith.mulf %19, %20 : vector<16x128xf32>
    %c0_11 = arith.constant 0 : index
    %c0_12 = arith.constant 0 : index
    %22 = vector.load %arg3[%c0_11, %c0_12] : memref<16x128xf32, #tpu.memory_space<vmem>>, vector<16x128xf32>
    %23 = arith.addf %21, %22 : vector<16x128xf32>
    %24 = arith.truncf %23 : vector<16x128xf32> to vector<16x128xbf16>
    %c0_13 = arith.constant 0 : index
    %c0_14 = arith.constant 0 : index
    %25 = vector.load %arg4[%c0_13, %c0_14] : memref<128x384xbf16, #tpu.memory_space<vmem>>, vector<128x384xbf16>
    %cst_15 = arith.constant dense<0.000000e+00> : vector<16x384xf32>
    %26 = tpu.matmul %24, %25, %cst_15 {dimension_numbers = #tpu.dot_dimension_numbers<[1], [0], [0], [1], [0, 0, 1, 1], [], []>} : vector<16x128xbf16>, vector<128x384xbf16>, vector<16x384xf32> -> vector<16x384xf32>
    %c0_16 = arith.constant 0 : index
    %c0_17 = arith.constant 0 : index
    %27 = vector.load %arg5[%c0_16, %c0_17] : memref<1x384xf32, #tpu.memory_space<vmem>>, vector<1x384xf32>
    %28 = vector.broadcast %27 : vector<1x384xf32> to vector<16x384xf32>
    %29 = arith.addf %26, %28 : vector<16x384xf32>
    %30 = vector.extract_strided_slice %29 {offsets = [0, 0], sizes = [16, 128], strides = [1, 1]} : vector<16x384xf32> to vector<16x128xf32>
    %31 = vector.extract_strided_slice %29 {offsets = [0, 128], sizes = [16, 128], strides = [1, 1]} : vector<16x384xf32> to vector<16x128xf32>
    %32 = vector.extract_strided_slice %29 {offsets = [0, 256], sizes = [16, 128], strides = [1, 1]} : vector<16x384xf32> to vector<16x128xf32>
    %33 = arith.truncf %30 : vector<16x128xf32> to vector<16x128xbf16>
    %34 = arith.truncf %31 : vector<16x128xf32> to vector<16x128xbf16>
    %cst_18 = arith.constant dense<0.000000e+00> : vector<16x16xf32>
    %35 = tpu.matmul %33, %34, %cst_18 {dimension_numbers = #tpu.dot_dimension_numbers<[1], [1], [0], [0], [0, 0, 1, 0], [], []>} : vector<16x128xbf16>, vector<16x128xbf16>, vector<16x16xf32> -> vector<16x16xf32>
    %c0_19 = arith.constant 0 : index
    %c0_20 = arith.constant 0 : index
    %36 = vector.load %arg7[%c0_19, %c0_20] : memref<16x16xf32, #tpu.memory_space<vmem>>, vector<16x16xf32>
    %37 = arith.addf %35, %36 : vector<16x16xf32>
    %cst_21 = arith.constant dense<0xFF800000> : vector<16xf32>
    %38 = vector.multi_reduction <maximumf>, %37, %cst_21 [0] : vector<16x16xf32> to vector<16xf32>
    %39 = vector.shape_cast %38 : vector<16xf32> to vector<1x16xf32>
    %40 = vector.broadcast %39 : vector<1x16xf32> to vector<16x16xf32>
    %41 = arith.subf %37, %40 : vector<16x16xf32>
    %42 = math.exp %41 : vector<16x16xf32>
    %cst_22 = arith.constant dense<0.000000e+00> : vector<16xf32>
    %43 = vector.multi_reduction <add>, %42, %cst_22 [0] : vector<16x16xf32> to vector<16xf32>
    %44 = vector.shape_cast %43 : vector<16xf32> to vector<1x16xf32>
    %45 = tpu.reciprocal %44 {approx = true} : vector<1x16xf32> -> vector<1x16xf32>
    %46 = vector.broadcast %45 : vector<1x16xf32> to vector<16x16xf32>
    %47 = arith.mulf %42, %46 : vector<16x16xf32>
    %48 = arith.truncf %47 : vector<16x16xf32> to vector<16x16xbf16>
    %49 = arith.truncf %32 : vector<16x128xf32> to vector<16x128xbf16>
    %cst_23 = arith.constant dense<0.000000e+00> : vector<16x128xf32>
    %50 = tpu.matmul %48, %49, %cst_23 {dimension_numbers = #tpu.dot_dimension_numbers<[1], [0], [0], [1], [0, 0, 1, 1], [], []>} : vector<16x16xbf16>, vector<16x128xbf16>, vector<16x128xf32> -> vector<16x128xf32>
    %51 = arith.addf %50, %0 : vector<16x128xf32>
    %c0_24 = arith.constant 0 : index
    %c0_25 = arith.constant 0 : index
    %52 = vector.load %arg8[%c0_24, %c0_25] : memref<16x128xf32, #tpu.memory_space<vmem>>, vector<16x128xf32>
    tpu.vector_store %arg8[%c0_24, %c0_25], %51 {strides = array<i32>} : memref<16x128xf32, #tpu.memory_space<vmem>>, vector<16x128xf32>,
    return
  }
  func.func @transform_0(%arg0: i32) -> (i32, i32) {
    %c0_i32 = arith.constant 0 : i32
    %c0_i32_0 = arith.constant 0 : i32
    return %arg0, %c0_i32 : i32, i32
  }
  func.func @transform_1(%arg0: i32) -> (i32, i32) {
    %c0_i32 = arith.constant 0 : i32
    %c0_i32_0 = arith.constant 0 : i32
    %c0_i32_1 = arith.constant 0 : i32
    return %c0_i32, %c0_i32_0 : i32, i32
  }
  func.func @transform_2(%arg0: i32) -> (i32, i32) {
    %c0_i32 = arith.constant 0 : i32
    %c0_i32_0 = arith.constant 0 : i32
    %c0_i32_1 = arith.constant 0 : i32
    return %c0_i32, %c0_i32_0 : i32, i32
  }
  func.func @transform_3(%arg0: i32) -> (i32, i32) {
    %c0_i32 = arith.constant 0 : i32
    %c0_i32_0 = arith.constant 0 : i32
    %c0_i32_1 = arith.constant 0 : i32
    return %c0_i32, %c0_i32_0 : i32, i32
  }
  func.func @transform_4(%arg0: i32) -> (i32, i32) {
    %c0_i32 = arith.constant 0 : i32
    %c0_i32_0 = arith.constant 0 : i32
    %c0_i32_1 = arith.constant 0 : i32
    return %c0_i32, %c0_i32_0 : i32, i32
  }
  func.func @transform_5(%arg0: i32) -> (i32, i32) {
    %c0_i32 = arith.constant 0 : i32
    %c0_i32_0 = arith.constant 0 : i32
    %c0_i32_1 = arith.constant 0 : i32
    return %c0_i32, %c0_i32_0 : i32, i32
  }
  func.func @transform_6(%arg0: i32) -> (i32, i32) {
    %c0_i32 = arith.constant 0 : i32
    %c0_i32_0 = arith.constant 0 : i32
    %c0_i32_1 = arith.constant 0 : i32
    return %c0_i32, %c0_i32_0 : i32, i32
  }
  func.func @transform_7(%arg0: i32) -> (i32, i32) {
    %c0_i32 = arith.constant 0 : i32
    %c0_i32_0 = arith.constant 0 : i32
    return %arg0, %c0_i32 : i32, i32
  }
}

</mosaic_0001>

<bundles_post_ra>
// kernel: tpu_custom_call.1
= control target key start
LH: loop header
LB: loop body
LE: loop exit
PB: predicated region body
PF: predicated region fallthrough
CT: control target
= control target key end

     0   :  { %12 = vsyncpa [#allocation3], 0  ;;  %s2049_s0 = inlined_call_operand.hbm [shape: f32[32,128], index: 0, kind: input, shape index: {}]   ;;  %s2050_s1 = inlined_call_operand.hbm [shape: f32[16,128], index: 1, kind: input, shape index: {}]   ;;  %s2051_s2 = inlined_call_operand.hbm [shape: f32[16,128], index: 2, kind: input, shape index: {}]   ;;  %s2052_s3 = inlined_call_operand.hbm [shape: bf16[128,384], index: 3, kind: input, shape index: {}]   ;;  %s2053_s4 = inlined_call_operand.hbm [shape: f32[1,384], index: 4, kind: input, shape index: {}]   ;;  %s2054_s5 = inlined_call_operand.vmem [shape: f32[16,16], index: 5, kind: input, shape index: {}]   ;;  %s2055_s6 = inlined_call_operand.hbm [shape: f32[16,16], index: 6, kind: input, shape index: {}]   ;;  %s2056_s7 = inlined_call_operand.hbm [shape: f32[32,128], index: 7, kind: output, shape index: {}]  }
   0x1   :  { %14 = vsyncpa [#allocation3 + $0x1], 0 }
   0x2   :  { %15 = vsyncpa [#allocation6], 0 }
   0x3   :  { %16 = vsyncpa [#allocation9], 0 }
   0x4   :  { %17 = vsyncpa [#allocation12], 0 }
   0x5   :  { %18 = vsyncpa [#allocation4], 0 }
   0x6   :  { %20 = vsyncpa [#allocation4 + $0x1], 0  ;;  %s1685_s24 = smov 0   ;;  %s1687_s25 = smov 0  }
   0x7   :  { %s1689_s26 = smov 0   ;;  %s1691_s27 = smov 0  }
   0x8 LB: > { %s1629_s28 = smov [#allocation5]   ;;  %s1706_s30 = sadd.s32 4294967295, %s1627_s27   ;;  %s1627_s27 = sphi %s1691_s27, %s2083_s27   ;;  %s1623_s26 = sphi %s1689_s26, %s2082_s26   ;;  %s1619_s25 = sphi %s1687_s25, %s2081_s25   ;;  %s1615_s24 = sphi %s1685_s24, %s2080_s24  }
   0x9   : > { %s221_s29 = sshll.u32 %s1629_s28, 4  ;;  %p1100_p0 = scmp.ge.s32.totalorder %s1627_s27, 1  ;;  %s1711_s29 = int_to_ptr.vmem [resolvable:$true] %s221_s29 }
   0xa   : > { %p2057_p1 = scmp.eq.s32.totalorder %s1706_s30, 0  ;;  %p209_p2 = scmp.lt.s32.totalorder %s1627_s27, 3 }
   0xb   : > { %s1630_s9 = smov [#allocation8]   ;;  %s1631_s12 = smov [#allocation7]  }
   0xc   : > { %p1713_p3 = pnand %p1100_p0, %p209_p2  ;;  %s247_s10 = sshll.u32 %s1630_s9, 4  ;;  %s1726_s10 = int_to_ptr.vmem [resolvable:$true] %s247_s10 }
   0xd   : > { %s1728_s13 = sshll.u32 %s1631_s12, 4  ;;  %s1379_s16 = scalar_lea.hbm %s2050_s1, 256  ;;  %s235_s13 = int_to_ptr.vmem [resolvable:$true] %s1728_s13 }
   0xe   : > { %s2061_s8 = scalar_select %p1713_p3, 1, 0 }
   0xf   : > { %p1253_p5 = pneg %p1713_p3  ;;  %p1380_p7 = scmp.ne.s32.totalorder %s2050_s1, %s1379_s16 }
  0x10   : > { %p1386_p11 = scmp.lt.u32.totalorder %s1379_s16, %s2050_s1 }
  0x11   : > { %p1722_p6 = pnand %p1253_p5, %p2057_p1 }
  0x13   : > { %p1738_p8 = pneg %p1722_p6 }
  0x15   : > { %p1382_p9 = pnand %p1738_p8, %p1380_p7 }
  0x17   : > { %p1383_p10 = pneg %p1382_p9 }
  0x19   : > { %p1388_p12 = pnand %p1386_p11, %p1383_p10 }
  0x1b   : > { %1391 = shalt.err (!%p1388_p12)
}
  0x1c   : > { %s1392_s22 = scalar_lea.vmem %s1711_s29, 256  ;;  %p1400_p5 = scmp.lt.s32.totalorder %s1711_s29, %s1711_s29 }
  0x1d   : > { %p1393_p13 = scmp.ne.s32.totalorder %s1711_s29, %s1392_s22  ;;  %p1401_p4 = scmp.lt.s32.totalorder %s1392_s22, %s1392_s22 }
  0x1f   : > { %p1395_p0 = pnand %p1393_p13, %p1738_p8  ;;  %p1402_p7 = por %p1401_p4, %p1400_p5 }
  0x21   : > { %p1396_p2 = pneg %p1395_p0 }
  0x23   : > { %p1403_p9 = pnand %p1402_p7, %p1396_p2 }
  0x25   : > { %1406 = shalt.err (!%p1403_p9)
}
  0x26   : > { %s2059_s23 = smov 128   ;;  %s1633_s28 = smov 8  }
  0x27   : > { %1256 = dma.hbm_to_vmem [thread:$0]  (!%p1722_p6), %s2050_s1, 256, %s1711_s29, [#allocation6], %s2059_s23, %s2059_s23, %s1633_s28  }
  0x28   : > { %s1407_s16 = scalar_lea.hbm %s2052_s3, 3072 }
  0x29   : > { %p1408_p4 = scmp.ne.s32.totalorder %s2052_s3, %s1407_s16  ;;  %p1414_p12 = scmp.lt.u32.totalorder %s1407_s16, %s2052_s3 }
  0x2b   : > { %p1410_p10 = pnand %p1408_p4, %p1738_p8 }
  0x2d   : > { %p1411_p11 = pneg %p1410_p10 }
  0x2f   : > { %p1416_p13 = pnand %p1414_p12, %p1411_p11 }
  0x31   : > { %1419 = shalt.err (!%p1416_p13)
}
  0x32   : > { %s1420_s29 = scalar_lea.vmem %s1726_s10, 3072  ;;  %p1428_p7 = scmp.lt.s32.totalorder %s1726_s10, %s1726_s10 }
  0x33   : > { %p1421_p0 = scmp.ne.s32.totalorder %s1726_s10, %s1420_s29  ;;  %p1429_p9 = scmp.lt.s32.totalorder %s1420_s29, %s1420_s29 }
  0x35   : > { %p1423_p2 = pnand %p1421_p0, %p1738_p8  ;;  %p1430_p4 = por %p1429_p9, %p1428_p7 }
  0x37   : > { %p1424_p5 = pneg %p1423_p2 }
  0x39   : > { %p1431_p10 = pnand %p1430_p4, %p1424_p5 }
  0x3b   : > { %1434 = shalt.err (!%p1431_p10)
}
  0x3c   : > { %s1634_s22 = smov 192   ;;  %s1635_s9 = smov 12  }
  0x3d   : > { %1262 = dma.hbm_to_vmem [thread:$0]  (!%p1722_p6), %s2052_s3, 3072, %s1726_s10, [#allocation9], %s1634_s22, %s1634_s22, %s1635_s9  }
  0x3e   : > { %s1435_s17 = scalar_lea.hbm %s2051_s2, 256 }
  0x3f   : > { %p1436_p11 = scmp.ne.s32.totalorder %s2051_s2, %s1435_s17  ;;  %p1442_p0 = scmp.lt.u32.totalorder %s1435_s17, %s2051_s2 }
  0x41   : > { %p1438_p12 = pnand %p1436_p11, %p1738_p8 }
  0x43   : > { %p1439_p13 = pneg %p1438_p12 }
  0x45   : > { %p1444_p2 = pnand %p1442_p0, %p1439_p13 }
  0x47   : > { %1447 = shalt.err (!%p1444_p2)
}
  0x48   : > { %s1448_s12 = scalar_lea.vmem %s235_s13, 256  ;;  %p1456_p4 = scmp.lt.s32.totalorder %s235_s13, %s235_s13 }
  0x49   : > { %p1449_p5 = scmp.ne.s32.totalorder %s235_s13, %s1448_s12  ;;  %p1457_p10 = scmp.lt.s32.totalorder %s1448_s12, %s1448_s12 }
  0x4b   : > { %p1451_p7 = pnand %p1449_p5, %p1738_p8  ;;  %p1458_p1 = por %p1457_p10, %p1456_p4 }
  0x4d   : > { %p1452_p9 = pneg %p1451_p7 }
  0x4f   : > { %p1459_p3 = pnand %p1458_p1, %p1452_p9 }
  0x51   : > { %1462 = shalt.err (!%p1459_p3)
}
  0x52   : > { %1259 = dma.hbm_to_vmem [thread:$0]  (!%p1722_p6), %s2051_s2, 256, %s235_s13, [#allocation6], %s2059_s23, %s2059_s23, %s1633_s28  }
  0x53   : > { %s1636_s9 = smov [#allocation10]   ;;  %s1637_s15 = smov [#allocation11]  }
  0x54   : > { %s261_s14 = sshll.u32 %s1636_s9, 4  ;;  %s274_s16 = sshll.u32 %s1637_s15, 4  ;;  %s262_s14 = int_to_ptr.vmem [resolvable:$true] %s261_s14  ;;  %s275_s16 = int_to_ptr.vmem [resolvable:$true] %s274_s16 }
  0x55   : > { %s1463_s20 = scalar_lea.hbm %s2053_s4, 48 }
  0x56   : > { %p1464_p1 = scmp.ne.s32.totalorder %s2053_s4, %s1463_s20  ;;  %p1470_p12 = scmp.lt.u32.totalorder %s1463_s20, %s2053_s4 }
  0x58   : > { %p1466_p3 = pnand %p1464_p1, %p1738_p8 }
  0x5a   : > { %p1467_p11 = pneg %p1466_p3 }
  0x5c   : > { %p1472_p13 = pnand %p1470_p12, %p1467_p11 }
  0x5e   : > { %1475 = shalt.err (!%p1472_p13)
}
  0x5f   : > { %s1476_s13 = scalar_lea.vmem %s262_s14, 48  ;;  %s1483_s22 = scalar_lea.vmem %s262_s14, 64 }
  0x60   : > { %p1477_p0 = scmp.ne.s32.totalorder %s262_s14, %s1476_s13  ;;  %p1484_p7 = scmp.lt.s32.totalorder %s262_s14, %s262_s14 }
  0x61   : > { %p1485_p9 = scmp.lt.s32.totalorder %s1483_s22, %s1476_s13 }
  0x62   : > { %p1479_p2 = pnand %p1477_p0, %p1738_p8 }
  0x63   : > { %p1486_p4 = por %p1485_p9, %p1484_p7 }
  0x64   : > { %p1480_p5 = pneg %p1479_p2 }
  0x66   : > { %p1487_p10 = pnand %p1486_p4, %p1480_p5 }
  0x68   : > { %1490 = shalt.err (!%p1487_p10)
}
  0x69   : > { %1265 = dma.hbm_to_vmem [thread:$0]  (!%p1722_p6), %s2053_s4, 48, %s262_s14, [#allocation9]  }
  0x6a   : > { %s1491_s20 = scalar_lea.hbm %s2055_s6, 256 }
  0x6b   : > { %p1492_p1 = scmp.ne.s32.totalorder %s2055_s6, %s1491_s20  ;;  %p1498_p12 = scmp.lt.u32.totalorder %s1491_s20, %s2055_s6 }
  0x6d   : > { %p1494_p3 = pnand %p1492_p1, %p1738_p8 }
  0x6f   : > { %p1495_p11 = pneg %p1494_p3 }
  0x71   : > { %p1500_p13 = pnand %p1498_p12, %p1495_p11 }
  0x73   : > { %1503 = shalt.err (!%p1500_p13)
}
  0x74   : > { %s1504_s13 = scalar_lea.vmem %s275_s16, 256  ;;  %p1512_p7 = scmp.lt.s32.totalorder %s275_s16, %s275_s16 }
  0x75   : > { %p1505_p0 = scmp.ne.s32.totalorder %s275_s16, %s1504_s13  ;;  %p1513_p9 = scmp.lt.s32.totalorder %s1504_s13, %s1504_s13 }
  0x77   : > { %p1507_p2 = pnand %p1505_p0, %p1738_p8  ;;  %p1514_p4 = por %p1513_p9, %p1512_p7 }
  0x79   : > { %p1508_p5 = pneg %p1507_p2 }
  0x7b   : > { %p1515_p10 = pnand %p1514_p4, %p1508_p5 }
  0x7d   : > { %1518 = shalt.err (!%p1515_p10)
}
  0x7e   : > { %1268 = dma.hbm_to_vmem [thread:$0]  (!%p1722_p6), %s2055_s6, 256, %s275_s16, [#allocation12], %s2059_s23, %s2059_s23, %s1633_s28  }
  0x7f   : > { %s1099_s11 = sadd.s32 4294967294, %s1627_s27   ;;  %s1848_s19 = sadd.s32 1, %s1627_s27  }
  0x80   : > { %s33_s9 = sadd.s32 1, %s1623_s26  ;;  %s30_s15 = ssub.s32 %s1627_s27, %s1848_s19 }
  0x81   : > { %p40_p8 = scmp.ne.s32.totalorder %s1623_s26, %s1619_s25  ;;  %p31_p1 = scmp.eq.s32.totalorder %s30_s15, 0 }
  0x82   : > { %p41_p3 = scmp.eq.s32.totalorder %s1627_s27, 0  ;;  %p46_p11 = scmp.ne.s32.totalorder %s1619_s25, %s1615_s24 }
  0x83   : > { %p196_p12 = scmp.eq.s32.totalorder %s1706_s30, 1  ;;  %p2064_p0 = scmp.eq.s32.totalorder %s1706_s30, 0 }
  0x84   : > { %s1860_s17 = scalar_select %p31_p1, %s1623_s26, %s33_s9  }
  0x85   : > { %p42_p13 = por %p41_p3, %p40_p8  ;;  %p1864_p2 = por %p2064_p0, %p46_p11 }
  0x86   : > { %p1868_p6 = por %p196_p12, %p40_p8  ;;  %p202_p5 = scmp.eq.s32.totalorder %s1099_s11, 1 }
  0x87   : > { %p1282_p7 = scmp.lt.s32.totalorder %s1627_s27, 2  ;;  %s288_s20 = sand.u32 1, %s1623_s26  }
  0x88   : > { %s2066_s16 = scalar_select %p1868_p6, 1, 0 }
  0x89   : > { %p1874_p9 = por %p202_p5, %p46_p11  ;;  %s1107_s29 = sshll.u32 %s288_s20, 4 }
  0x8a   : > { %s1152_s12 = sshll.u32 %s1627_s27, 8  ;;  %s292_s22 = scalar_lea.vmem [#allocation2], %s1107_s29 }
  0x8b   : > { %s2067_s21 = scalar_select %p1874_p9, 1, 0 }
  0x8c   : > { %s1882_s14 = scalar_lea.hbm %s2049_s0, %s1152_s12  ;;  %s299_s9 = sshll.u32 %s292_s22, 4  ;;  %s1888_s9 = int_to_ptr.vmem [resolvable:$true] %s299_s9 }
  0x8d   : > { %p1884_p4 = pnand %p1282_p7, %p42_p13  ;;  %s1890_s15 = scalar_lea.sflag [#allocation3], %s288_s20 }
  0x8e   : > { %s1519_s23 = scalar_lea.hbm %s1882_s14, 256  ;;  %s1524_s10 = scalar_lea.hbm %s2049_s0, 512 }
  0x8f   : > { %p1520_p10 = scmp.ne.s32.totalorder %s1882_s14, %s1519_s23  ;;  %p1521_p8 = pneg %p1884_p4 }
  0x90   : > { %p1525_p11 = scmp.lt.u32.totalorder %s1882_s14, %s2049_s0  ;;  %p1526_p12 = scmp.lt.u32.totalorder %s1524_s10, %s1519_s23 }
  0x91   : > { %p1522_p1 = pnand %p1521_p8, %p1520_p10  ;;  %p1528_p0 = scmp.lt.u32.totalorder %s1519_s23, %s1882_s14 }
  0x92   : > { %p1527_p13 = por %p1526_p12, %p1525_p11 }
  0x93   : > { %p1523_p3 = pneg %p1522_p1 }
  0x94   : > { %p1529_p5 = por %p1528_p0, %p1527_p13 }
  0x96   : > { %p1530_p7 = pnand %p1529_p5, %p1523_p3 }
  0x98   : > { %1533 = shalt.err (!%p1530_p7)
}
  0x99   : > { %s1534_s20 = scalar_lea.vmem %s1888_s9, 256  ;;  %s1638_s29 = smov [#allocation2]  }
  0x9a   : > { %p1535_p10 = scmp.ne.s32.totalorder %s1888_s9, %s1534_s20  ;;  %s1539_s12 = sshll.u32 %s1638_s29, 4  ;;  %s1540_s12 = int_to_ptr.vmem [resolvable:$false] %s1539_s12 }
  0x9b   : > { %s1541_s13 = scalar_lea.vmem %s1540_s12, 512  ;;  %p1542_p6 = scmp.lt.s32.totalorder %s1888_s9, %s1540_s12 }
  0x9c   : > { %p1537_p1 = pnand %p1535_p10, %p1521_p8  ;;  %p1543_p11 = scmp.lt.s32.totalorder %s1541_s13, %s1534_s20 }
  0x9e   : > { %p1538_p9 = pneg %p1537_p1  ;;  %p1544_p12 = por %p1543_p11, %p1542_p6 }
  0xa0   : > { %p1545_p13 = pnand %p1544_p12, %p1538_p9 }
  0xa2   : > { %1548 = shalt.err (!%p1545_p13)
}
  0xa3   : > { %s2069_s23 = smov 128   ;;  %p2070_p8 = scmp.ne.s32.totalorder %s2061_s8, 0 }
  0xa4   : > { %1272 = dma.hbm_to_vmem [thread:$0]  (!%p1884_p4), %s1882_s14, 256, %s1888_s9, %s1890_s15, %s2069_s23, %s2069_s23, %s1633_s28  }
  0xa5   : > { %311 = sbr.rel (%p2070_p8) target bundleno = 1933 (0x78d), region = 48  ;;  %s1924_s10 = sand.u32 (!%p2070_p8), 1, %s1619_s25  }
  0xa6   : > { %s1111_s22 = sshll.u32 (!%p2070_p8), %s1924_s10, 4  ;;  %s314_s20 = scalar_lea.sflag (!%p2070_p8), [#allocation3], %s1924_s10 }
  0xa7   : > { %s317_s11 = scalar_lea.vmem (!%p2070_p8), [#allocation2], %s1111_s22 }
  0xac   : > { %1594 = dma.done.wait (%p1864_p2), %s314_s20, 256  }
  0xad   : > { %1596 = vsyncadd (%p1864_p2), %s314_s20, 4294967040  ;;  %p2071_p6 = scmp.eq.s32.totalorder %s1706_s30, 0 }
  0xaf   : > { %1598 = dma.done.wait (%p2071_p6), [#allocation6], 512   ;;  %p2072_p9 = pmov %p2071_p6 }
  0xb0   : > { %p2073_p4 = pmov %p2071_p6 }
  0xb1   : > { %1600 = vsyncadd (%p2072_p9), [#allocation6], 4294966784 }
  0xb2   : > { %1602 = dma.done.wait (%p2073_p4), [#allocation9], 3120   ;;  %p2074_p3 = pmov %p2073_p4 }
  0xb4   : > { %1604 = vsyncadd (%p2074_p3), [#allocation9], 4294964176  ;;  %p2075_p0 = pmov %p2074_p3 }
  0xb6   : > { %1606 = dma.done.wait (%p2075_p0), [#allocation12], 256   ;;  %p2076_p5 = pmov %p2075_p0 }
  0xb7   : > { %v1946_v0 = vld [vmem:[%s317_s11] sm:$0xff]  ;;  %v1948_v1 = vld [vmem:[%s317_s11 + $0x8] sm:$0xff]  ;;  %vm379_vm0 = vcmask 130048   ;;  %v1639_v7 = vmov 0   ;;  %v1640_v23 = vmov 0.0   ;;  %vm1641_vm1 = vmmov 0  }
  0xb8   : > { %1608 = vsyncadd (%p2076_p5), [#allocation12], 4294967040  ;;  %375 = vadd.xlane.f32.xlu0 %v1946_v0  ;;  %v373_v2 = vld [vmem:[%s2054_s5] sm:$0xff]  ;;  %v374_v6 = vld [vmem:[%s2054_s5 + $0x8] sm:$0xff]  ;;  %1335 = vset.pattern.permute.xlu1 %v1639_v7  ;;  %s367_s9 = scalar_lea.vmem [#allocation13], %s1111_s22  ;;  %s1153_s29 = sshll.u32 %s1706_s30, 8 }
  0xb9   : > { %1179 = vmatprep.mubr.msk.f32.mxu0 %vm379_vm0, %v373_v2  ;;  %1186 = vmatprep.mubr.msk.f32.mxu1 %vm379_vm0, %v373_v2  ;;  %v1337_v21 = vld [vmem:[#allocation8] ss:$12 sps:$4 sm:$0xff]   ;;  %v1339_v22 = vld [vmem:[#allocation8 + $0x4] ss:$12 sps:$4 sm:$0xff]   ;;  %v1340_v24 = vld [vmem:[#allocation8 + $0x8] ss:$12 sps:$4 sm:$0xff]   ;;  %s2004_s23 = scalar_lea.hbm %s2056_s7, %s1153_s29 }
  0xba   : > { %1336 = vset.pattern.permute.xlu0 %v1639_v7  ;;  %v1343_v25 = vld [vmem:[#allocation8 + $0x1c] ss:$12 sps:$4 sm:$0xff]   ;;  %v1341_v26 = vld [vmem:[#allocation8 + $0x18] ss:$12 sps:$4 sm:$0xff]   ;;  %v1344_v27 = vld [vmem:[#allocation8 + $0x20] ss:$12 sps:$4 sm:$0xff]  }
  0xbb   : > { %v1347_v28 = vld [vmem:[#allocation8 + $0x34] ss:$12 sps:$4 sm:$0xff]   ;;  %v1345_v29 = vld [vmem:[#allocation8 + $0x30] ss:$12 sps:$4 sm:$0xff]   ;;  %v1348_v30 = vld [vmem:[#allocation8 + $0x38] ss:$12 sps:$4 sm:$0xff]  }
  0xbc   : > { %377 = vadd.xlane.f32.xlu0 %v1948_v1  ;;  %v1351_v31 = vld [vmem:[#allocation8 + $0x4c] ss:$12 sps:$4 sm:$0xff]   ;;  %v1349_v32 = vld [vmem:[#allocation8 + $0x48] ss:$12 sps:$4 sm:$0xff]   ;;  %v1352_v33 = vld [vmem:[#allocation8 + $0x50] ss:$12 sps:$4 sm:$0xff]  }
  0xbd   : > { %v1355_v34 = vld [vmem:[#allocation8 + $0x64] ss:$12 sps:$4 sm:$0xff]   ;;  %v1353_v35 = vld [vmem:[#allocation8 + $0x60] ss:$12 sps:$4 sm:$0xff]   ;;  %v1356_v36 = vld [vmem:[#allocation8 + $0x68] ss:$12 sps:$4 sm:$0xff]  }
  0xbe   : > { %v1359_v37 = vld [vmem:[#allocation8 + $0x7c] ss:$12 sps:$4 sm:$0xff]   ;;  %v1357_v38 = vld [vmem:[#allocation8 + $0x78] ss:$12 sps:$4 sm:$0xff]   ;;  %v1360_v39 = vld [vmem:[#allocation8 + $0x80] ss:$12 sps:$4 sm:$0xff]  }
  0xbf   : > { %v1363_v47 = vld [vmem:[#allocation8 + $0x94] ss:$12 sps:$4 sm:$0xff]   ;;  %v1361_v49 = vld [vmem:[#allocation8 + $0x90] ss:$12 sps:$4 sm:$0xff]   ;;  %v1364_v50 = vld [vmem:[#allocation8 + $0x98] ss:$12 sps:$4 sm:$0xff]  }
  0xc0   : > { %v1367_v51 = vld [vmem:[#allocation8 + $0xac] ss:$12 sps:$4 sm:$0xff]   ;;  %v1365_v52 = vld [vmem:[#allocation8 + $0xa8] ss:$12 sps:$4 sm:$0xff]   ;;  %v1368_v53 = vld [vmem:[#allocation8 + $0xb0] ss:$12 sps:$4 sm:$0xff]  }
  0xc1   : > { %v575_v54 = vld [vmem:[#allocation5 + $0x8] sm:$0xff]  ;;  %v574_v57 = vld [vmem:[#allocation5] sm:$0xff]  ;;  %v579_v59 = vld [vmem:[#allocation7 + $0x8] sm:$0xff]  ;;  %s978_s15 = sshll.u32 %s367_s9, 4  ;;  %s965_s30 = scalar_lea.sflag [#allocation4], %s1924_s10  ;;  %s1999_s15 = int_to_ptr.vmem [resolvable:$true] %s978_s15 }
  0xc2   : > { %v578_v62 = vld [vmem:[#allocation7] sm:$0xff]  ;;  %s1549_s22 = scalar_lea.vmem %s1999_s15, 256  ;;  %p2077_p7 = scmp.ne.s32.totalorder %s2066_s16, 0 }
  0xc3   : > { %p1550_p2 = scmp.ne.s32.totalorder %s1999_s15, %s1549_s22  ;;  %s1642_s20 = smov [#allocation13]  }
  0xc4   : > { %s1553_s11 = sshll.u32 %s1642_s20, 4  ;;  %s1554_s11 = int_to_ptr.vmem [resolvable:$false] %s1553_s11 }
  0xc5   : > { %p1551_p10 = pnand %p1550_p2, %p2077_p7  ;;  %s1555_s8 = scalar_lea.vmem %s1554_s11, 512 }
  0xc6   : > { %p1556_p11 = scmp.lt.s32.totalorder %s1999_s15, %s1554_s11  ;;  %p1557_p12 = scmp.lt.s32.totalorder %s1555_s8, %s1549_s22 }
  0xc7   : > { %p1552_p1 = pneg %p1551_p10 }
  0xc8   : > { %p1558_p13 = por %p1557_p12, %p1556_p11 }
  0xca   : > { %p1559_p8 = pnand %p1558_p13, %p1552_p1 }
 0x145   : > { %v376_v3 = vpop.xlane.xlu0 %375 }
 0x149   : > { %v378_v4 = vpop.xlane.xlu0 %377 }
 0x14a   : > { %v1221_v5 = vpack.c.bf16 %v378_v4, %v376_v3 }
 0x14c   : > { %1222 = vmatprep.subr.bf16.mxu0 %v1221_v5 }
 0x14d   : > { %1224 = vmatpush3.bf16.msra.mxu0 %v1221_v5  ;;  %v617_v5 = vlaneseq }
 0x14e   : > { %760 = vmatprep.subr.bf16.mxu0 %v1339_v22 }
 0x150   : > { %1180 = vmatmul.mubr.msk.f32.vlgmr.msra.gmra.mrb[0].mxu0 %vm379_vm0, %v374_v6 }
 0x151   : > { %792 = vmatprep.mubr.bf16.mxu0 %v1639_v7  ;;  %761 = vmatpush1.bf16.msra.mxu0 %v1337_v21 }
 0x152   : > { %762 = vmatprep.subr.bf16.mxu0 %v1343_v25 }
 0x155   : > { %763 = vmatpush1.bf16.msra.mxu0 %v1341_v26 }
 0x156   : > { %764 = vmatprep.subr.bf16.mxu0 %v1347_v28 }
 0x159   : > { %765 = vmatpush1.bf16.msra.mxu0 %v1345_v29 }
 0x15a   : > { %766 = vmatprep.subr.bf16.mxu0 %v1351_v31  ;;  %v846_v31 = vld [vmem:[#allocation11] sm:$0xff] }
 0x15d   : > { %767 = vmatpush1.bf16.msra.mxu0 %v1349_v32 }
 0x15e   : > { %768 = vmatprep.subr.bf16.mxu0 %v1355_v34 }
 0x161   : > { %769 = vmatpush1.bf16.msra.mxu0 %v1353_v35 }
 0x162   : > { %770 = vmatprep.subr.bf16.mxu0 %v1359_v37 }
 0x165   : > { %771 = vmatpush1.bf16.msra.mxu0 %v1357_v38 }
 0x166   : > { %772 = vmatprep.subr.bf16.mxu0 %v1363_v47 }
 0x169   : > { %773 = vmatpush1.bf16.msra.mxu0 %v1361_v49 }
 0x16a   : > { %774 = vmatprep.subr.bf16.mxu0 %v1367_v51 }
 0x16d   : > { %775 = vmatpush1.bf16.msra.mxu0 %v1365_v52 }
 0x16e   : > { %1209 = vmatprep.subr.bf16.mxu0 %v1640_v23 }
 0x223   : > { %v1181_v8 = vpop.f32.mrb[0].mxu0 }
 0x224   : > { %v452_v9 = vpop.f32.mrb[1].mxu0  ;;  %v462_v11 = vmul.f32 0.001953125, %v1181_v8 }
 0x225   : > { %v461_v10 = vmul.f32 0.001953125, %v452_v9  ;;  %v615_v9 = vld [vmem:[#allocation10] sm:$0x7] }
 0x227   : > { %465 = vperm.xlu1 %1335, %v461_v10  }
 0x22b   : > { %470 = vperm.xlu1 %1335, %v462_v11  }
 0x2a6   : > { %v466_v12 = vpop.permute.xlu1 %465 }
 0x2a7   : > { %v1962_v13 = vsub.f32 %v1946_v0, %v466_v12 }
 0x2a9   : > { %v475_v14 = vmul.f32 %v1962_v13, %v1962_v13 }
 0x2aa   : > { %v471_v15 = vpop.permute.xlu1 %470 }
 0x2ab   : > { %v1967_v16 = vsub.f32 %v1948_v1, %v471_v15  ;;  %477 = vadd.xlane.f32.xlu0 %v475_v14 }
 0x2ad   : > { %v476_v17 = vmul.f32 %v1967_v16, %v1967_v16 }
 0x2af   : > { %479 = vadd.xlane.f32.xlu1 %v476_v17 }
 0x338   : > { %v478_v18 = vpop.xlane.xlu0 %477 }
 0x33c   : > { %v480_v19 = vpop.xlane.xlu1 %479 }
 0x33d   : > { %v1225_v20 = vpack.c.bf16 %v480_v19, %v478_v18 }
 0x33f   : > { %1226 = vmatprep.subr.bf16.mxu1 %v1225_v20 }
 0x340   : > { %1228 = vmatpush3.bf16.msra.mxu1 %v1225_v20 }
 0x341   : > { %1189 = vmatprep.subr.bf16.mxu1 %v1640_v23 }
 0x343   : > { %1187 = vmatmul.mubr.msk.f32.vlgmr.msra.gmra.mrb[0].mxu1 %vm379_vm0, %v374_v6  ;;  %v618_v6 = vshrl.u32 %v617_v5, 7 }
 0x344   : > { %1190 = vmatpush3.bf16.msra.mxu1 %v1340_v24  ;;  %1205 = vmatprep.mubr.msk.bf16.mxu1 %vm1641_vm1, %v1640_v23 }
 0x345   : > { %1191 = vmatprep.subr.bf16.mxu1 %v1640_v23  ;;  %v619_v7 = vsub.s32 0, %v618_v6  ;;  %v627_v8 = vsub.s32 2, %v618_v6  ;;  %v623_v10 = vsub.s32 1, %v618_v6 }
 0x347   : > { %v620_v11 = vrot.slane %v615_v9, %v619_v7  ;;  %v628_v12 = vrot.slane %v615_v9, %v627_v8  ;;  %v624_v15 = vrot.slane %v615_v9, %v623_v10 }
 0x348   : > { %1192 = vmatpush3.bf16.msra.mxu1 %v1344_v27 }
 0x349   : > { %1193 = vmatprep.subr.bf16.mxu1 %v1640_v23 }
 0x34c   : > { %1194 = vmatpush3.bf16.msra.mxu1 %v1348_v30 }
 0x34d   : > { %1195 = vmatprep.subr.bf16.mxu1 %v1640_v23 }
 0x350   : > { %1196 = vmatpush3.bf16.msra.mxu1 %v1352_v33  ;;  %v847_v33 = vld [vmem:[#allocation11 + $0x8] sm:$0xff] }
 0x351   : > { %1197 = vmatprep.subr.bf16.mxu1 %v1640_v23 }
 0x354   : > { %1198 = vmatpush3.bf16.msra.mxu1 %v1356_v36 }
 0x355   : > { %1199 = vmatprep.subr.bf16.mxu1 %v1640_v23 }
 0x358   : > { %1200 = vmatpush3.bf16.msra.mxu1 %v1360_v39 }
 0x359   : > { %1201 = vmatprep.subr.bf16.mxu1 %v1640_v23 }
 0x35c   : > { %1202 = vmatpush3.bf16.msra.mxu1 %v1364_v50 }
 0x35d   : > { %1203 = vmatprep.subr.bf16.mxu1 %v1640_v23 }
 0x360   : > { %1204 = vmatpush3.bf16.msra.mxu1 %v1368_v53 }
 0x361   : > { %1215 = vmatprep.subr.bf16.mxu1 %v1640_v23 }
 0x416   : > { %v1188_v40 = vpop.f32.mrb[0].mxu1 }
 0x417   : > { %v557_v41 = vmul.f32 0.001953125, %v1188_v40  ;;  %v547_v42 = vpop.f32.mrb[1].mxu1 }
 0x418   : > { %v556_v43 = vmul.f32 0.001953125, %v547_v42 }
 0x419   : > { %v559_v44 = vadd.f32 1e-05, %v557_v41 }
 0x41a   : > { %v558_v45 = vadd.f32 1e-05, %v556_v43 }
 0x41b   : > { %1369 = vrsqrt.f32 %v559_v44 }
 0x41c   : > { %1371 = vrsqrt.f32 %v558_v45 }
 0x425   : > { %v1370_v46 = vpop.eup %1369 }
 0x426   : > { %v1372_v48 = vpop.eup %1371  ;;  %569 = vperm.xlu1 %1335, %v1370_v46  }
 0x427   : > { %564 = vperm.xlu0 %1336, %v1372_v48  }
 0x4a5   : > { %v570_v55 = vpop.permute.xlu1 %569 }
 0x4a6   : > { %v573_v56 = vmul.f32 %v570_v55, %v1967_v16  ;;  %v565_v58 = vpop.permute.xlu0 %564 }
 0x4a7   : > { %v572_v60 = vmul.f32 %v565_v58, %v1962_v13 }
 0x4a8   : > { %v577_v61 = vmul.f32 %v575_v54, %v573_v56 }
 0x4a9   : > { %v576_v63 = vmul.f32 %v574_v57, %v572_v60 }
 0x4aa   : > { %v581_v2 = vadd.f32 %v579_v59, %v577_v61 }
 0x4ab   : > { %v580_v3 = vadd.f32 %v578_v62, %v576_v63 }
 0x4ad   : > { %v582_v4 = vpack.c.bf16 %v581_v2, %v580_v3 }
 0x4af   : > { %793 = vmatmul.mubr.bf16.vlgmr.msra.gmra.mrb[4].mxu0 %v582_v4  ;;  %1206 = vmatmul.mubr.bf16.vlgmr.msra.gmra.mrb[4].mxu1 %v582_v4 }
 0x4b0   : > { %1211 = vmatprep.mubr.msk.bf16.mxu0 %vm1641_vm1, %v1640_v23  ;;  %1217 = vmatprep.mubr.msk.bf16.mxu1 %vm1641_vm1, %v1640_v23 }
 0x582   : > { %v794_v13 = vpop.f32.mrb[4].mxu0  ;;  %v837_v14 = vpop.f32.mrb[4].mxu1 }
 0x583   : > { %v796_v16 = vpop.f32.mrb[5].mxu0  ;;  %v1207_v17 = vpop.f32.mrb[5].mxu1  ;;  %v795_v20 = vadd.f32 %v794_v13, %v620_v11  ;;  %v838_v21 = vadd.f32 %v837_v14, %v628_v12 }
 0x584   : > { %v798_v18 = vpop.f32.mrb[6].mxu0  ;;  %v840_v19 = vpop.f32.mrb[6].mxu1  ;;  %v797_v26 = vadd.f32 %v796_v16, %v624_v15 }
 0x585   : > { %v799_v22 = vadd.f32 %v798_v18, %v620_v11  ;;  %v841_v24 = vadd.f32 %v840_v19, %v628_v12  ;;  %v800_v23 = vpop.f32.mrb[7].mxu0  ;;  %v1208_v25 = vpop.f32.mrb[7].mxu1 }
 0x586   : > { %v801_v27 = vadd.f32 %v800_v23, %v624_v15 }
 0x587   : > { %v844_v28 = vpack.c.bf16 %v799_v22, %v795_v20  ;;  %v917_v29 = vpack.c.bf16 %v841_v24, %v838_v21 }
 0x588   : > { %v845_v30 = vpack.c.bf16 %v801_v27, %v797_v26 }
 0x589   : > { %1216 = vmatpush3.bf16.msra.mxu1 %v917_v29 }
 0x58a   : > { %1210 = vmatpush3.bf16.xpose.msra.mxu0 %v845_v30 }
 0x591   : > { %1212 = vmatmul.mubr.bf16.vlgmr.msra.gmra.mrb[8].mxu0 %v844_v28 }
 0x664   : > { %v882_v32 = vpop.f32.mrb[8].mxu0 }
 0x665   : > { %v883_v34 = vadd.f32 %v882_v32, %v846_v31  ;;  %v1213_v35 = vpop.f32.mrb[9].mxu0 }
 0x666   : > { %v885_v36 = vpop.f32.mrb[10].mxu0 }
 0x667   : > { %v886_v37 = vadd.f32 %v885_v36, %v847_v33  ;;  %v1214_v38 = vpop.f32.mrb[11].mxu0  ;;  %v889_v39 = vsel %vm379_vm0, %v883_v34, -inf }
 0x669   : > { %v890_v40 = vsel %vm379_vm0, %v886_v37, -inf }
 0x66a   : > { %v891_v41 = vmax.f32 %v889_v39, %v890_v40 }
 0x66c   : > { %v892_v42 = vrot.slane %v891_v41, 4 }
 0x66e   : > { %v893_v43 = vmax.f32 %v891_v41, %v892_v42 }
 0x670   : > { %v894_v44 = vrot.slane %v893_v43, 2 }
 0x672   : > { %v895_v45 = vmax.f32 %v893_v43, %v894_v44 }
 0x674   : > { %v896_v46 = vrot.slane %v895_v45, 1 }
 0x676   : > { %v897_v47 = vmax.f32 %v895_v45, %v896_v46 }
 0x678   : > { %v898_v48 = vsub.f32 %v883_v34, %v897_v47  ;;  %v899_v49 = vsub.f32 %v886_v37, %v897_v47 }
 0x67a   : > { %v900_v50 = vmul.f32 1.442695, %v898_v48  ;;  %v902_v51 = vmul.f32 1.442695, %v899_v49 }
 0x67c   : > { %1373 = vpow2.f32 %v900_v50 }
 0x67d   : > { %1375 = vpow2.f32 %v902_v51 }
 0x686   : > { %v1374_v52 = vpop.eup %1373 }
 0x687   : > { %v1376_v53 = vpop.eup %1375  ;;  %v904_v54 = vsel %vm379_vm0, %v1374_v52, 0.0 }
 0x688   : > { %v905_v55 = vsel %vm379_vm0, %v1376_v53, 0.0 }
 0x689   : > { %v906_v56 = vadd.f32 %v905_v55, %v904_v54 }
 0x68b   : > { %v907_v57 = vrot.slane %v906_v56, 4 }
 0x68d   : > { %v908_v58 = vadd.f32 %v907_v57, %v906_v56 }
 0x68f   : > { %v909_v59 = vrot.slane %v908_v58, 2 }
 0x691   : > { %v910_v60 = vadd.f32 %v909_v59, %v908_v58 }
 0x693   : > { %v911_v61 = vrot.slane %v910_v60, 1 }
 0x695   : > { %v912_v62 = vadd.f32 %v911_v61, %v910_v60 }
 0x697   : > { %1377 = vrcp.f32 %v912_v62 }
 0x6a1   : > { %v1378_v63 = vpop.eup %1377 }
 0x6a2   : > { %v914_v2 = vmul.f32 %v1378_v63, %v1374_v52  ;;  %v915_v3 = vmul.f32 %v1378_v63, %v1376_v53 }
 0x6a4   : > { %v916_v4 = vpack.c.bf16 %v915_v3, %v914_v2 }
 0x6a6   : > { %1218 = vmatmul.mubr.msk.bf16.vlgmr.msra.gmra.mrb[8].mxu1 %vm379_vm0, %v916_v4 }
 0x779   : > { %v955_v5 = vpop.f32.mrb[8].mxu1 }
 0x77a   : > { %v956_v6 = vadd.f32 %v955_v5, %v1946_v0  ;;  %v1219_v7 = vpop.f32.mrb[9].mxu1 }
 0x77b   : > { %v958_v8 = vpop.f32.mrb[10].mxu1 }
 0x77c   : > { %962 = vst [vmem:[%s367_s9] sm:$0xff] %v956_v6  ;;  %v959_v9 = vadd.f32 %v958_v8, %v1948_v1  ;;  %v1220_v10 = vpop.f32.mrb[11].mxu1 }
 0x77e   : > { %963 = vst [vmem:[%s367_s9 + $0x8] sm:$0xff] %v959_v9 }
 0x77f   : > { %1562 = shalt.err (!%p1559_p8)
}
 0x780   : > { %s1563_s28 = scalar_lea.hbm %s2004_s23, 256  ;;  %s1567_s9 = scalar_lea.hbm %s2056_s7, 512 }
 0x781   : > { %p1564_p6 = scmp.ne.s32.totalorder %s2004_s23, %s1563_s28  ;;  %p1568_p3 = scmp.lt.u32.totalorder %s2004_s23, %s2056_s7 }
 0x782   : > { %p1569_p0 = scmp.lt.u32.totalorder %s1567_s9, %s1563_s28  ;;  %p1571_p2 = scmp.lt.u32.totalorder %s1563_s28, %s2004_s23 }
 0x783   : > { %p1565_p9 = pnand %p1564_p6, %p2077_p7 }
 0x784   : > { %p1570_p5 = por %p1569_p0, %p1568_p3 }
 0x785   : > { %p1566_p4 = pneg %p1565_p9 }
 0x786   : > { %p1572_p10 = por %p1571_p2, %p1570_p5 }
 0x788   : > { %p1573_p1 = pnand %p1572_p10, %p1566_p4 }
 0x78a   : > { %1576 = shalt.err (!%p1573_p1)
}
 0x78b   : > { %s1643_s13 = smov 128   ;;  %s1644_s22 = smov 8  }
 0x78c   : > { %1251 = dma.vmem_to_hbm [thread:$0]  (%p2077_p7), %s1999_s15, 256, %s2004_s23, %s965_s30, %s1643_s13, %s1643_s13, %s1644_s22  }
 0x78d PF: > { %s993_s20 = sand.u32 1, %s1615_s24   ;;  %p2078_p11 = scmp.ne.s32.totalorder %s2067_s21, 0 }
 0x78e   : > { %p2079_p12 = scmp.ge.s32.totalorder %s1627_s27, 2  ;;  %s994_s11 = scalar_lea.sflag [#allocation4], %s993_s20 }
 0x790   : > { %p1274_p13 = pnand %p2079_p12, %p2078_p11 }
 0x792   : > { %1610 = dma.done.wait (!%p1274_p13), %s994_s11, 256  }
 0x793   : > { %1612 = vsyncadd (!%p1274_p13), %s994_s11, 4294967040  ;;  %p23_p8 = scmp.ge.s32.totalorder %s1848_s19, 4   ;;  %s2080_s24 = smov %s1619_s25 }
 0x794   : > { %s2081_s25 = smov %s1623_s26  ;;  %s2082_s26 = smov %s1860_s17 }
 0x795   : > { %s2083_s27 = smov %s1848_s19  ;;  %25 = sbr.rel (!%p23_p8) target bundleno = 8 (0x8), region = 113 }
 0x79c   :  { %999 = vsyncpa [#allocation3], 1 }
 0x79d   :  { %1001 = vsyncpa [#allocation3 + $0x1], 1 }
 0x79e   :  { %1002 = vsyncpa [#allocation6], 1 }
 0x79f   :  { %1003 = vsyncpa [#allocation9], 1 }
 0x7a0   :  { %1004 = vsyncpa [#allocation12], 1 }
 0x7a1   :  { %1005 = vsyncpa [#allocation4], 1 }
 0x7a2   :  { %1007 = vsyncpa [#allocation4 + $0x1], 1 }

</bundles_post_ra>
